<compile_context>
chip_gen: v6e
topology: v6e:2x2x1
jax: 0.10.0
libtpu: 0.0.40
codegen_flags: <defaults>
</compile_context>

<pallas_src>
import functools

import jax
import jax.numpy as jnp
from jax import lax
from jax.experimental import pallas as pl
from jax.experimental.pallas import tpu as pltpu


def _decoder_kernel(q_ref, wcls_ref, bcls_ref,
                    w1_ref, b1_ref, w2_ref, b2_ref, w3_ref, b3_ref,
                    pix_ref,
                    logits_ref, masks_ref, semseg_ref,
                    me_scr, clsT_scr,
                    *, n_chunks, chunk, bf16_sigmoid):
    """Grid = (batch, spatial_split, hw_tile). Batch dim is squeezed in all views."""

    # ---- per-batch work: class head, MLP, softmax — hoisted to the first HW tile ----
    @pl.when(pl.program_id(2) == 0)
    def _per_batch():
        q = q_ref[...]                                               # (Q, D) f32

        # class head (incl. no-object column) — kept in f32 for exact logits.
        logits = jnp.dot(q, wcls_ref[...],
                         preferred_element_type=jnp.float32) + bcls_ref[...]
        logits_ref[...] = logits                                     # (Q, C+1) f32

        # 3-layer mask-embed MLP: bf16 MXU operands, f32 accumulation.
        qb = q.astype(jnp.bfloat16)
        h = jnp.maximum(jnp.dot(qb, w1_ref[...].astype(jnp.bfloat16),
                                preferred_element_type=jnp.float32) + b1_ref[...], 0.0)
        h = jnp.maximum(jnp.dot(h.astype(jnp.bfloat16), w2_ref[...].astype(jnp.bfloat16),
                                preferred_element_type=jnp.float32) + b2_ref[...], 0.0)
        me = jnp.dot(h.astype(jnp.bfloat16), w3_ref[...].astype(jnp.bfloat16),
                     preferred_element_type=jnp.float32) + b3_ref[...]
        me_scr[...] = me.astype(jnp.bfloat16)                        # (Q, D) bf16

        # softmax over classes (f32, exact reciprocal — once per batch, negligible),
        # drop the no-object column, transpose once.
        m = logits - jnp.max(logits, axis=-1, keepdims=True)
        e = jnp.exp(m)
        probs = e / jnp.sum(e, axis=-1, keepdims=True)
        clsT_scr[...] = probs[:, :-1].T.astype(jnp.bfloat16)         # (C, Q) bf16

    # ---- per-HW-tile work: two bf16 MXU GEMMs, chunked along lanes so the
    #      (Q, chunk) intermediates stay small and VMEM goes to the DMA tile. ----
    def process(off):
        pix_c = pix_ref[:, pl.ds(off, chunk)].astype(jnp.bfloat16)   # (D, chunk)
        pred = jnp.dot(me_scr[...], pix_c,
                       preferred_element_type=jnp.float32)           # (Q, chunk) f32
        masks_ref[:, pl.ds(off, chunk)] = pred.astype(masks_ref.dtype)

        if bf16_sigmoid:                                             # v6e/v7x bf16 EUP
            sig = jax.nn.sigmoid(pred.astype(jnp.bfloat16))
        else:                                                        # v5e: f32 EUP
            sig = jax.nn.sigmoid(pred).astype(jnp.bfloat16)

        semseg_ref[:, pl.ds(off, chunk)] = jnp.dot(
            clsT_scr[...], sig,
            preferred_element_type=jnp.float32).astype(semseg_ref.dtype)

    if n_chunks == 1:
        process(0)
    else:
        def body(c, carry):
            process(pl.multiple_of(c * chunk, chunk))
            return carry
        lax.fori_loop(0, n_chunks, body, 0, unroll=True)


def _vmem_capacity_bytes():
    try:
        return int(pltpu.get_tpu_info().vmem_capacity_bytes)
    except Exception:
        return 64 * 1024 * 1024          # conservative (v7x-sized) fallback


def _supports_bf16_eup():
    """True on chips with a bf16 VPU/EUP (v6e, v7x); False on v5e and older."""
    try:
        kind = jax.devices()[0].device_kind.lower()
    except Exception:
        return False
    return not any(v in kind for v in ("v2", "v3", "v4", "v5"))


def _pick_tile(HW, Q, D, C, Cp1, in_bytes, out_bytes, vmem_cap):
    """VMEM-aware spatial tile: per-lane cost of the double-buffered spatial blocks
    plus the fixed (weights / hidden / logits / scratch) footprint, capped by a
    fraction of the chip's physical VMEM."""
    fixed = 2 * 4 * (3 * D * D + D * Cp1 + 3 * D + Cp1 + Q * D + Q * Cp1)  # f32, 2-buf
    fixed += 2 * (Q * D + C * Q)                                            # bf16 scratch
    per_lane = 2 * (D * in_bytes + (Q + C) * out_bytes)                     # 2-buffered
    budget = int(0.4 * vmem_cap) - fixed
    if budget < per_lane * 128:
        tn = 128
    else:
        tn = min(8192, (budget // per_lane) // 128 * 128)
    # don't tile wider than the (128-rounded) spatial extent
    tn = min(tn, max(128, ((HW + 127) // 128) * 128))
    return max(128, tn)


@functools.partial(jax.jit, static_argnames=("tn",))
def openseed_decoder_forward(hidden_states, pixel_features, params, *, tn=None):
    """hidden_states: [B, Q, D] f32; pixel_features: [B, D, HW] (f32 or bf16)."""
    B, Q, D = hidden_states.shape
    _, _, HW = pixel_features.shape
    Cp1 = params["w_cls"].shape[1]                   # num_classes + 1
    C = Cp1 - 1

    in_bytes = jnp.dtype(pixel_features.dtype).itemsize
    out_bytes = 2                                    # bf16 masks / semseg
    vmem_cap = _vmem_capacity_bytes()

    if tn is None:
        tn = _pick_tile(HW, Q, D, C, Cp1, in_bytes, out_bytes, vmem_cap)
    assert tn % 128 == 0, "spatial tile must be lane-aligned (multiple of 128)"

    # Pad HW up to a tile multiple instead of collapsing to a single huge block.
    # TODO(synk): ideally the pixel decoder emits a padded (and bf16) feature map so
    # this wrapper pass never runs.
    HW_pad = ((HW + tn - 1) // tn) * tn
    pix = pixel_features
    if HW_pad != HW:
        pix = jnp.pad(pix, ((0, 0), (0, 0), (0, HW_pad - HW)))
    n_tiles = HW_pad // tn

    # Split the spatial axis in two so both v7x TensorCores are busy even at B=1.
    # On single-TC chips this only costs one extra (tiny) per-batch head recompute.
    n_split = 2 if (n_tiles % 2 == 0 and n_tiles >= 2) else 1
    tps = n_tiles // n_split

    # Lane sub-chunking of the per-tile compute (bounds the (Q, chunk) intermediates).
    n_chunks = max(1, tn // 1024)
    if tn % n_chunks:
        n_chunks = 1
    chunk = tn // n_chunks

    bf16_sig = _supports_bf16_eup()

    kernel = functools.partial(_decoder_kernel, n_chunks=n_chunks, chunk=chunk,
                               bf16_sigmoid=bf16_sig)

    full2d = lambda b, s, t: (0, 0)

    grid_spec = pltpu.PrefetchScalarGridSpec(
        num_scalar_prefetch=0,
        grid=(B, n_split, tps),
        in_specs=[
            pl.BlockSpec((None, Q, D), lambda b, s, t: (b, 0, 0)),       # hidden_states
            pl.BlockSpec((D, Cp1), full2d),                              # w_cls
            pl.BlockSpec((1, Cp1), full2d),                              # b_cls
            pl.BlockSpec((D, D), full2d),                                # w1
            pl.BlockSpec((1, D), full2d),                                # b1
            pl.BlockSpec((D, D), full2d),                                # w2
            pl.BlockSpec((1, D), full2d),                                # b2
            pl.BlockSpec((D, D), full2d),                                # w3
            pl.BlockSpec((1, D), full2d),                                # b3
            pl.BlockSpec((None, D, tn),
                         lambda b, s, t: (b, 0, s * tps + t)),           # pixel feats
        ],
        out_specs=[
            pl.BlockSpec((None, Q, Cp1), lambda b, s, t: (b, 0, 0)),     # class logits
            pl.BlockSpec((None, Q, tn),
                         lambda b, s, t: (b, 0, s * tps + t)),           # pred masks
            pl.BlockSpec((None, C, tn),
                         lambda b, s, t: (b, 0, s * tps + t)),           # semantic map
        ],
        scratch_shapes=[
            pltpu.VMEM((Q, D), jnp.bfloat16),    # mask_embed, cached per batch/split
            pltpu.VMEM((C, Q), jnp.bfloat16),    # mask_cls^T, cached per batch/split
        ],
    )

    out_shape = (
        jax.ShapeDtypeStruct((B, Q, Cp1), jnp.float32),
        jax.ShapeDtypeStruct((B, Q, HW_pad), jnp.bfloat16),
        jax.ShapeDtypeStruct((B, C, HW_pad), jnp.bfloat16),
    )

    vmem_limit = int(max(32 * 1024 * 1024,
                         min(vmem_cap - 20 * 1024 * 1024, 96 * 1024 * 1024)))

    logits, masks, semseg = pl.pallas_call(
        kernel,
        out_shape=out_shape,
        grid_spec=grid_spec,
        compiler_params=pltpu.CompilerParams(
            dimension_semantics=("parallel", "parallel", "arbitrary"),
            vmem_limit_bytes=vmem_limit),
    )(hidden_states,
      params["w_cls"], params["b_cls"],
      params["w1"], params["b1"],
      params["w2"], params["b2"],
      params["w3"], params["b3"],
      pix)

    if HW_pad != HW:
        masks = masks[..., :HW]
        semseg = semseg[..., :HW]
    return logits, masks, semseg


def _reference(hidden_states, pixel_features, params):
    """Pure-JAX reference with the same dtype policy (bf16 GEMM operands, f32 accum)."""
    logits = jnp.einsum("bqd,dc->bqc", hidden_states, params["w_cls"]) + params["b_cls"]

    hb = hidden_states.astype(jnp.bfloat16)
    h = jax.nn.relu(jnp.einsum("bqd,de->bqe", hb, params["w1"].astype(jnp.bfloat16),
                               preferred_element_type=jnp.float32) + params["b1"])
    h = jax.nn.relu(jnp.einsum("bqd,de->bqe", h.astype(jnp.bfloat16),
                               params["w2"].astype(jnp.bfloat16),
                               preferred_element_type=jnp.float32) + params["b2"])
    me = jnp.einsum("bqd,de->bqe", h.astype(jnp.bfloat16),
                    params["w3"].astype(jnp.bfloat16),
                    preferred_element_type=jnp.float32) + params["b3"]

    masks = jnp.einsum("bqd,bdn->bqn",
                       me.astype(jnp.bfloat16),
                       pixel_features.astype(jnp.bfloat16),
                       preferred_element_type=jnp.float32)
    mask_cls = jax.nn.softmax(logits, axis=-1)[..., :-1]
    semseg = jnp.einsum("bqc,bqn->bcn",
                        mask_cls.astype(jnp.bfloat16),
                        jax.nn.sigmoid(masks).astype(jnp.bfloat16),
                        preferred_element_type=jnp.float32)
    return logits, masks, semseg


def _init_params(key, D, num_classes):
    ks = jax.random.split(key, 8)
    s = 0.1
    return {
        "w_cls": s * jax.random.normal(ks[0], (D, num_classes + 1), jnp.float32),
        "b_cls": s * jax.random.normal(ks[1], (1, num_classes + 1), jnp.float32),
        "w1": s * jax.random.normal(ks[2], (D, D), jnp.float32),
        "b1": s * jax.random.normal(ks[3], (1, D), jnp.float32),
        "w2": s * jax.random.normal(ks[4], (D, D), jnp.float32),
        "b2": s * jax.random.normal(ks[5], (1, D), jnp.float32),
        "w3": s * jax.random.normal(ks[6], (D, D), jnp.float32),
        "b3": s * jax.random.normal(ks[7], (1, D), jnp.float32),
    }


if __name__ == "__main__":
    B, Q, D = 2, 16, 32
    H = W = 16
    HW = H * W
    num_classes = 7                     # +1 no-object column inside the head
    TN = 128                            # 2 spatial tiles -> exercises hoist + split

    key = jax.random.PRNGKey(0)
    k_hs, k_pix, k_par = jax.random.split(key, 3)

    hidden_states = jax.random.normal(k_hs, (B, Q, D), jnp.float32)
    pixel_features = jax.random.normal(k_pix, (B, D, HW), jnp.float32)   # [B, D, H*W]
    params = _init_params(k_par, D, num_classes)

    logits, masks, semseg = openseed_decoder_forward(
        hidden_states, pixel_features, params, tn=TN)
    jax.block_until_ready((logits, masks, semseg))

    ref_logits, ref_masks, ref_semseg = _reference(hidden_states, pixel_features, params)
    assert jnp.allclose(logits, ref_logits, atol=1e-4, rtol=1e-4)
    assert jnp.allclose(masks.astype(jnp.float32), ref_masks, atol=3e-2, rtol=3e-2)
    assert jnp.allclose(semseg.astype(jnp.float32), ref_semseg, atol=4e-2, rtol=4e-2)

    # semantic map back to NCHW if desired: (B, C, H, W)
    _ = semseg.reshape(B, num_classes, H, W)

    print("KERNEL_OK")
</pallas_src>

<mosaic_0001>
module attributes {stable_mosaic.version = 11 : i64} {
  func.func @_decoder_kernel(%arg0: i32, %arg1: i32, %arg2: i32, %arg3: memref<1x16x32xf32, #tpu.memory_space<vmem>>, %arg4: memref<32x8xf32, #tpu.memory_space<vmem>>, %arg5: memref<1x8xf32, #tpu.memory_space<vmem>>, %arg6: memref<32x32xf32, #tpu.memory_space<vmem>>, %arg7: memref<1x32xf32, #tpu.memory_space<vmem>>, %arg8: memref<32x32xf32, #tpu.memory_space<vmem>>, %arg9: memref<1x32xf32, #tpu.memory_space<vmem>>, %arg10: memref<32x32xf32, #tpu.memory_space<vmem>>, %arg11: memref<1x32xf32, #tpu.memory_space<vmem>>, %arg12: memref<1x32x128xf32, #tpu.memory_space<vmem>>, %arg13: memref<1x16x8xf32, #tpu.memory_space<vmem>>, %arg14: memref<1x16x128xbf16, #tpu.memory_space<vmem>>, %arg15: memref<1x7x128xbf16, #tpu.memory_space<vmem>>, %arg16: memref<16x32xbf16, #tpu.memory_space<vmem>>, %arg17: memref<7x16xbf16, #tpu.memory_space<vmem>>) attributes {dimension_semantics = [#tpu.dimension_semantics<parallel>, #tpu.dimension_semantics<parallel>, #tpu.dimension_semantics<arbitrary>], iteration_bounds = array<i64: 2, 2, 1>, scalar_prefetch = 0 : i64, scratch_operands = 2 : i64, tpu.core_type = #tpu.core_type<tc>, window_params = [{transform_indices = @transform_0, window_bounds = array<i64: 1, 16, 32>}, {pipeline_mode = #tpu.pipeline_mode<synchronous>, transform_indices = @transform_1, window_bounds = array<i64: 32, 8>}, {pipeline_mode = #tpu.pipeline_mode<synchronous>, transform_indices = @transform_2, window_bounds = array<i64: 1, 8>}, {pipeline_mode = #tpu.pipeline_mode<synchronous>, transform_indices = @transform_3, window_bounds = array<i64: 32, 32>}, {pipeline_mode = #tpu.pipeline_mode<synchronous>, transform_indices = @transform_4, window_bounds = array<i64: 1, 32>}, {pipeline_mode = #tpu.pipeline_mode<synchronous>, transform_indices = @transform_5, window_bounds = array<i64: 32, 32>}, {pipeline_mode = #tpu.pipeline_mode<synchronous>, transform_indices = @transform_6, window_bounds = array<i64: 1, 32>}, {pipeline_mode = #tpu.pipeline_mode<synchronous>, transform_indices = @transform_7, window_bounds = array<i64: 32, 32>}, {pipeline_mode = #tpu.pipeline_mode<synchronous>, transform_indices = @transform_8, window_bounds = array<i64: 1, 32>}, {transform_indices = @transform_9, window_bounds = array<i64: 1, 32, 128>}, {transform_indices = @transform_10, window_bounds = array<i64: 1, 16, 8>}, {transform_indices = @transform_11, window_bounds = array<i64: 1, 16, 128>}, {transform_indices = @transform_12, window_bounds = array<i64: 1, 7, 128>}]} {
    %c0_i32 = arith.constant 0 : i32
    %0 = arith.cmpi eq, %arg2, %c0_i32 : i32
    %1 = arith.extui %0 : i1 to i32
    %c0_i32_0 = arith.constant 0 : i32
    %2 = arith.cmpi ne, %1, %c0_i32_0 : i32
    scf.if %2 {
      %c0_15 = arith.constant 0 : index
      %c0_16 = arith.constant 0 : index
      %c0_17 = arith.constant 0 : index
      %24 = vector.load %arg3[%c0_15, %c0_16, %c0_17] : memref<1x16x32xf32, #tpu.memory_space<vmem>>, vector<1x16x32xf32>
      %25 = vector.shape_cast %24 : vector<1x16x32xf32> to vector<16x32xf32>
      %c0_18 = arith.constant 0 : index
      %c0_19 = arith.constant 0 : index
      %26 = vector.load %arg4[%c0_18, %c0_19] : memref<32x8xf32, #tpu.memory_space<vmem>>, vector<32x8xf32>
      %cst_20 = arith.constant dense<0.000000e+00> : vector<16x8xf32>
      %27 = tpu.matmul %25, %26, %cst_20 {dimension_numbers = #tpu.dot_dimension_numbers<[1], [0], [0], [1], [0, 0, 1, 1], [], []>} : vector<16x32xf32>, vector<32x8xf32>, vector<16x8xf32> -> vector<16x8xf32>
      %c0_21 = arith.constant 0 : index
      %c0_22 = arith.constant 0 : index
      %28 = vector.load %arg5[%c0_21, %c0_22] : memref<1x8xf32, #tpu.memory_space<vmem>>, vector<1x8xf32>
      %29 = vector.broadcast %28 : vector<1x8xf32> to vector<16x8xf32>
      %30 = arith.addf %27, %29 : vector<16x8xf32>
      %c0_23 = arith.constant 0 : index
      %c0_24 = arith.constant 0 : index
      %c0_25 = arith.constant 0 : index
      %31 = vector.load %arg13[%c0_23, %c0_24, %c0_25] : memref<1x16x8xf32, #tpu.memory_space<vmem>>, vector<1x16x8xf32>
      %32 = vector.shape_cast %31 : vector<1x16x8xf32> to vector<16x8xf32>
      %33 = vector.shape_cast %30 : vector<16x8xf32> to vector<1x16x8xf32>
      tpu.vector_store %arg13[%c0_23, %c0_24, %c0_25], %33 {strides = array<i32>} : memref<1x16x8xf32, #tpu.memory_space<vmem>>, vector<1x16x8xf32>,
      %34 = arith.truncf %25 : vector<16x32xf32> to vector<16x32xbf16>
      %c0_26 = arith.constant 0 : index
      %c0_27 = arith.constant 0 : index
      %35 = vector.load %arg6[%c0_26, %c0_27] : memref<32x32xf32, #tpu.memory_space<vmem>>, vector<32x32xf32>
      %36 = arith.truncf %35 : vector<32x32xf32> to vector<32x32xbf16>
      %cst_28 = arith.constant dense<0.000000e+00> : vector<16x32xf32>
      %37 = tpu.matmul %34, %36, %cst_28 {dimension_numbers = #tpu.dot_dimension_numbers<[1], [0], [0], [1], [0, 0, 1, 1], [], []>} : vector<16x32xbf16>, vector<32x32xbf16>, vector<16x32xf32> -> vector<16x32xf32>
      %c0_29 = arith.constant 0 : index
      %c0_30 = arith.constant 0 : index
      %38 = vector.load %arg7[%c0_29, %c0_30] : memref<1x32xf32, #tpu.memory_space<vmem>>, vector<1x32xf32>
      %39 = vector.broadcast %38 : vector<1x32xf32> to vector<16x32xf32>
      %40 = arith.addf %37, %39 : vector<16x32xf32>
      %cst_31 = arith.constant 0.000000e+00 : f32
      %41 = vector.broadcast %cst_31 : f32 to vector<16x32xf32>
      %42 = arith.maximumf %40, %41 : vector<16x32xf32>
      %43 = arith.truncf %42 : vector<16x32xf32> to vector<16x32xbf16>
      %c0_32 = arith.constant 0 : index
      %c0_33 = arith.constant 0 : index
      %44 = vector.load %arg8[%c0_32, %c0_33] : memref<32x32xf32, #tpu.memory_space<vmem>>, vector<32x32xf32>
      %45 = arith.truncf %44 : vector<32x32xf32> to vector<32x32xbf16>
      %cst_34 = arith.constant dense<0.000000e+00> : vector<16x32xf32>
      %46 = tpu.matmul %43, %45, %cst_34 {dimension_numbers = #tpu.dot_dimension_numbers<[1], [0], [0], [1], [0, 0, 1, 1], [], []>} : vector<16x32xbf16>, vector<32x32xbf16>, vector<16x32xf32> -> vector<16x32xf32>
      %c0_35 = arith.constant 0 : index
      %c0_36 = arith.constant 0 : index
      %47 = vector.load %arg9[%c0_35, %c0_36] : memref<1x32xf32, #tpu.memory_space<vmem>>, vector<1x32xf32>
      %48 = vector.broadcast %47 : vector<1x32xf32> to vector<16x32xf32>
      %49 = arith.addf %46, %48 : vector<16x32xf32>
      %cst_37 = arith.constant 0.000000e+00 : f32
      %50 = vector.broadcast %cst_37 : f32 to vector<16x32xf32>
      %51 = arith.maximumf %49, %50 : vector<16x32xf32>
      %52 = arith.truncf %51 : vector<16x32xf32> to vector<16x32xbf16>
      %c0_38 = arith.constant 0 : index
      %c0_39 = arith.constant 0 : index
      %53 = vector.load %arg10[%c0_38, %c0_39] : memref<32x32xf32, #tpu.memory_space<vmem>>, vector<32x32xf32>
      %54 = arith.truncf %53 : vector<32x32xf32> to vector<32x32xbf16>
      %cst_40 = arith.constant dense<0.000000e+00> : vector<16x32xf32>
      %55 = tpu.matmul %52, %54, %cst_40 {dimension_numbers = #tpu.dot_dimension_numbers<[1], [0], [0], [1], [0, 0, 1, 1], [], []>} : vector<16x32xbf16>, vector<32x32xbf16>, vector<16x32xf32> -> vector<16x32xf32>
      %c0_41 = arith.constant 0 : index
      %c0_42 = arith.constant 0 : index
      %56 = vector.load %arg11[%c0_41, %c0_42] : memref<1x32xf32, #tpu.memory_space<vmem>>, vector<1x32xf32>
      %57 = vector.broadcast %56 : vector<1x32xf32> to vector<16x32xf32>
      %58 = arith.addf %55, %57 : vector<16x32xf32>
      %59 = arith.truncf %58 : vector<16x32xf32> to vector<16x32xbf16>
      %c0_43 = arith.constant 0 : index
      %c0_44 = arith.constant 0 : index
      %60 = vector.load %arg16[%c0_43, %c0_44] : memref<16x32xbf16, #tpu.memory_space<vmem>>, vector<16x32xbf16>
      tpu.vector_store %arg16[%c0_43, %c0_44], %59 {strides = array<i32>} : memref<16x32xbf16, #tpu.memory_space<vmem>>, vector<16x32xbf16>,
      %cst_45 = arith.constant dense<0xFF800000> : vector<16xf32>
      %61 = vector.multi_reduction <maximumf>, %30, %cst_45 [1] : vector<16x8xf32> to vector<16xf32>
      %62 = vector.shape_cast %61 : vector<16xf32> to vector<16x1xf32>
      %63 = vector.broadcast %62 : vector<16x1xf32> to vector<16x8xf32>
      %64 = arith.subf %30, %63 : vector<16x8xf32>
      %65 = math.exp %64 : vector<16x8xf32>
      %cst_46 = arith.constant dense<0.000000e+00> : vector<16xf32>
      %66 = vector.multi_reduction <add>, %65, %cst_46 [1] : vector<16x8xf32> to vector<16xf32>
      %67 = vector.shape_cast %66 : vector<16xf32> to vector<16x1xf32>
      %68 = vector.broadcast %67 : vector<16x1xf32> to vector<16x8xf32>
      %69 = arith.divf %65, %68 : vector<16x8xf32>
      %70 = vector.extract_strided_slice %69 {offsets = [0, 0], sizes = [16, 7], strides = [1, 1]} : vector<16x8xf32> to vector<16x7xf32>
      %71 = tpu.transpose %70, [1, 0] : vector<16x7xf32> -> vector<7x16xf32>
      %72 = arith.truncf %71 : vector<7x16xf32> to vector<7x16xbf16>
      %c0_47 = arith.constant 0 : index
      %c0_48 = arith.constant 0 : index
      %73 = vector.load %arg17[%c0_47, %c0_48] : memref<7x16xbf16, #tpu.memory_space<vmem>>, vector<7x16xbf16>
      tpu.vector_store %arg17[%c0_47, %c0_48], %72 {strides = array<i32>} : memref<7x16xbf16, #tpu.memory_space<vmem>>, vector<7x16xbf16>,
    } else {
    }
    %c0 = arith.constant 0 : index
    %c0_1 = arith.constant 0 : index
    %c0_2 = arith.constant 0 : index
    %3 = vector.load %arg12[%c0, %c0_1, %c0_2] : memref<1x32x128xf32, #tpu.memory_space<vmem>>, vector<1x32x128xf32>
    %4 = vector.shape_cast %3 : vector<1x32x128xf32> to vector<32x128xf32>
    %5 = arith.truncf %4 : vector<32x128xf32> to vector<32x128xbf16>
    %c0_3 = arith.constant 0 : index
    %c0_4 = arith.constant 0 : index
    %6 = vector.load %arg16[%c0_3, %c0_4] : memref<16x32xbf16, #tpu.memory_space<vmem>>, vector<16x32xbf16>
    %cst = arith.constant dense<0.000000e+00> : vector<16x128xf32>
    %7 = tpu.matmul %6, %5, %cst {dimension_numbers = #tpu.dot_dimension_numbers<[1], [0], [0], [1], [0, 0, 1, 1], [], []>} : vector<16x32xbf16>, vector<32x128xbf16>, vector<16x128xf32> -> vector<16x128xf32>
    %8 = arith.truncf %7 : vector<16x128xf32> to vector<16x128xbf16>
    %c0_5 = arith.constant 0 : index
    %c0_6 = arith.constant 0 : index
    %c0_7 = arith.constant 0 : index
    %9 = vector.load %arg14[%c0_5, %c0_6, %c0_7] : memref<1x16x128xbf16, #tpu.memory_space<vmem>>, vector<1x16x128xbf16>
    %10 = vector.shape_cast %9 : vector<1x16x128xbf16> to vector<16x128xbf16>
    %11 = vector.shape_cast %8 : vector<16x128xbf16> to vector<1x16x128xbf16>
    tpu.vector_store %arg14[%c0_5, %c0_6, %c0_7], %11 {strides = array<i32>} : memref<1x16x128xbf16, #tpu.memory_space<vmem>>, vector<1x16x128xbf16>,
    %12 = arith.truncf %7 : vector<16x128xf32> to vector<16x128xbf16>
    %13 = arith.negf %12 : vector<16x128xbf16>
    %14 = math.exp %13 : vector<16x128xbf16>
    %cst_8 = arith.constant 1.000000e+00 : bf16
    %15 = vector.broadcast %cst_8 : bf16 to vector<16x128xbf16>
    %16 = arith.addf %15, %14 : vector<16x128xbf16>
    %17 = arith.divf %15, %16 : vector<16x128xbf16>
    %c0_9 = arith.constant 0 : index
    %c0_10 = arith.constant 0 : index
    %18 = vector.load %arg17[%c0_9, %c0_10] : memref<7x16xbf16, #tpu.memory_space<vmem>>, vector<7x16xbf16>
    %cst_11 = arith.constant dense<0.000000e+00> : vector<7x128xf32>
    %19 = tpu.matmul %18, %17, %cst_11 {dimension_numbers = #tpu.dot_dimension_numbers<[1], [0], [0], [1], [0, 0, 1, 1], [], []>} : vector<7x16xbf16>, vector<16x128xbf16>, vector<7x128xf32> -> vector<7x128xf32>
    %20 = arith.truncf %19 : vector<7x128xf32> to vector<7x128xbf16>
    %c0_12 = arith.constant 0 : index
    %c0_13 = arith.constant 0 : index
    %c0_14 = arith.constant 0 : index
    %21 = vector.load %arg15[%c0_12, %c0_13, %c0_14] : memref<1x7x128xbf16, #tpu.memory_space<vmem>>, vector<1x7x128xbf16>
    %22 = vector.shape_cast %21 : vector<1x7x128xbf16> to vector<7x128xbf16>
    %23 = vector.shape_cast %20 : vector<7x128xbf16> to vector<1x7x128xbf16>
    tpu.vector_store %arg15[%c0_12, %c0_13, %c0_14], %23 {strides = array<i32>} : memref<1x7x128xbf16, #tpu.memory_space<vmem>>, vector<1x7x128xbf16>,
    return
  }
  func.func @transform_0(%arg0: i32, %arg1: i32, %arg2: i32) -> (i32, i32, i32) {
    %c0_i32 = arith.constant 0 : i32
    %c0_i32_0 = arith.constant 0 : i32
    %c0_i32_1 = arith.constant 0 : i32
    return %arg0, %c0_i32, %c0_i32_0 : i32, i32, i32
  }
  func.func @transform_1(%arg0: i32, %arg1: i32, %arg2: i32) -> (i32, i32) {
    %c0_i32 = arith.constant 0 : i32
    %c0_i32_0 = arith.constant 0 : i32
    %c0_i32_1 = arith.constant 0 : i32
    return %c0_i32, %c0_i32_0 : i32, i32
  }
  func.func @transform_2(%arg0: i32, %arg1: i32, %arg2: i32) -> (i32, i32) {
    %c0_i32 = arith.constant 0 : i32
    %c0_i32_0 = arith.constant 0 : i32
    %c0_i32_1 = arith.constant 0 : i32
    return %c0_i32, %c0_i32_0 : i32, i32
  }
  func.func @transform_3(%arg0: i32, %arg1: i32, %arg2: i32) -> (i32, i32) {
    %c0_i32 = arith.constant 0 : i32
    %c0_i32_0 = arith.constant 0 : i32
    %c0_i32_1 = arith.constant 0 : i32
    return %c0_i32, %c0_i32_0 : i32, i32
  }
  func.func @transform_4(%arg0: i32, %arg1: i32, %arg2: i32) -> (i32, i32) {
    %c0_i32 = arith.constant 0 : i32
    %c0_i32_0 = arith.constant 0 : i32
    %c0_i32_1 = arith.constant 0 : i32
    return %c0_i32, %c0_i32_0 : i32, i32
  }
  func.func @transform_5(%arg0: i32, %arg1: i32, %arg2: i32) -> (i32, i32) {
    %c0_i32 = arith.constant 0 : i32
    %c0_i32_0 = arith.constant 0 : i32
    %c0_i32_1 = arith.constant 0 : i32
    return %c0_i32, %c0_i32_0 : i32, i32
  }
  func.func @transform_6(%arg0: i32, %arg1: i32, %arg2: i32) -> (i32, i32) {
    %c0_i32 = arith.constant 0 : i32
    %c0_i32_0 = arith.constant 0 : i32
    %c0_i32_1 = arith.constant 0 : i32
    return %c0_i32, %c0_i32_0 : i32, i32
  }
  func.func @transform_7(%arg0: i32, %arg1: i32, %arg2: i32) -> (i32, i32) {
    %c0_i32 = arith.constant 0 : i32
    %c0_i32_0 = arith.constant 0 : i32
    %c0_i32_1 = arith.constant 0 : i32
    return %c0_i32, %c0_i32_0 : i32, i32
  }
  func.func @transform_8(%arg0: i32, %arg1: i32, %arg2: i32) -> (i32, i32) {
    %c0_i32 = arith.constant 0 : i32
    %c0_i32_0 = arith.constant 0 : i32
    %c0_i32_1 = arith.constant 0 : i32
    return %c0_i32, %c0_i32_0 : i32, i32
  }
  func.func @transform_9(%arg0: i32, %arg1: i32, %arg2: i32) -> (i32, i32, i32) {
    %c1_i32 = arith.constant 1 : i32
    %0 = arith.muli %arg1, %c1_i32 : i32
    %1 = arith.addi %0, %arg2 : i32
    %c0_i32 = arith.constant 0 : i32
    %c0_i32_0 = arith.constant 0 : i32
    return %arg0, %c0_i32, %1 : i32, i32, i32
  }
  func.func @transform_10(%arg0: i32, %arg1: i32, %arg2: i32) -> (i32, i32, i32) {
    %c0_i32 = arith.constant 0 : i32
    %c0_i32_0 = arith.constant 0 : i32
    %c0_i32_1 = arith.constant 0 : i32
    return %arg0, %c0_i32, %c0_i32_0 : i32, i32, i32
  }
  func.func @transform_11(%arg0: i32, %arg1: i32, %arg2: i32) -> (i32, i32, i32) {
    %c1_i32 = arith.constant 1 : i32
    %0 = arith.muli %arg1, %c1_i32 : i32
    %1 = arith.addi %0, %arg2 : i32
    %c0_i32 = arith.constant 0 : i32
    %c0_i32_0 = arith.constant 0 : i32
    return %arg0, %c0_i32, %1 : i32, i32, i32
  }
  func.func @transform_12(%arg0: i32, %arg1: i32, %arg2: i32) -> (i32, i32, i32) {
    %c1_i32 = arith.constant 1 : i32
    %0 = arith.muli %arg1, %c1_i32 : i32
    %1 = arith.addi %0, %arg2 : i32
    %c0_i32 = arith.constant 0 : i32
    %c0_i32_0 = arith.constant 0 : i32
    return %arg0, %c0_i32, %1 : i32, i32, i32
  }
}

</mosaic_0001>

<bundles_post_ra>
// kernel: openseed_decoder_forward.1
= control target key start
LH: loop header
LB: loop body
LE: loop exit
PB: predicated region body
PF: predicated region fallthrough
CT: control target
= control target key end

     0   :  { %s2144_s0 = inlined_call_operand.vmem [shape: f32[2,16,32], index: 0, kind: input, shape index: {}]   ;;  %s2145_s1 = inlined_call_operand.vmem [shape: f32[32,8], index: 1, kind: input, shape index: {}]   ;;  %s2146_s2 = inlined_call_operand.vmem [shape: f32[1,8], index: 2, kind: input, shape index: {}]   ;;  %s2147_s3 = inlined_call_operand.hbm [shape: f32[32,32], index: 3, kind: input, shape index: {}]   ;;  %s2148_s4 = inlined_call_operand.vmem [shape: f32[1,32], index: 4, kind: input, shape index: {}]   ;;  %s2149_s5 = inlined_call_operand.hbm [shape: f32[32,32], index: 5, kind: input, shape index: {}]   ;;  %s2150_s6 = inlined_call_operand.vmem [shape: f32[1,32], index: 6, kind: input, shape index: {}]   ;;  %s2151_s7 = inlined_call_operand.hbm [shape: f32[32,32], index: 7, kind: input, shape index: {}]   ;;  %s2152_s8 = inlined_call_operand.vmem [shape: f32[1,32], index: 8, kind: input, shape index: {}]   ;;  %s2153_s9 = inlined_call_operand.hbm [shape: f32[2,32,256], index: 9, kind: input, shape index: {}]   ;;  %s2154_s10 = inlined_call_operand.vmem [shape: f32[2,16,8], index: 10, kind: output, shape index: {0}]   ;;  %s2155_s11 = inlined_call_operand.hbm [shape: bf16[2,16,256], index: 11, kind: output, shape index: {1}]   ;;  %s2156_s12 = inlined_call_operand.vmem [shape: bf16[2,7,256], index: 12, kind: output, shape index: {2}]  }
   0x1   :  { %2171 = sst [smem:[#allocation24_spill]] %s2147_s3 }
   0x2   :  { %2172 = sst [smem:[#allocation25_spill]] %s2149_s5 }
   0x3   :  { %2173 = sst [smem:[#allocation26_spill]] %s2150_s6 }
   0x4   :  { %2174 = sst [smem:[#allocation27_spill]] %s2151_s7 }
   0x5   :  { %2175 = sst [smem:[#allocation28_spill]] %s2152_s8 }
   0x6   :  { %2176 = sst [smem:[#allocation29_spill]] %s2155_s11 }
   0x7   :  { %2177 = sst [smem:[#allocation30_spill]] %s2156_s12 }
   0x8   :  { %18 = vsyncpa [#allocation5], 0 }
   0x9   :  { %19 = vsyncpa [#allocation8], 0 }
   0xa   :  { %20 = vsyncpa [#allocation11], 0 }
   0xb   :  { %22 = vsyncpa [#allocation11 + $0x1], 0 }
   0xc   :  { %23 = vsyncpa [#allocation6], 0 }
   0xd   :  { %25 = vsyncpa [#allocation6 + $0x1], 0  ;;  %s1825_s21 = smov 0   ;;  %s1827_s22 = smov 0  }
   0xe   :  { %s1829_s23 = smov 0   ;;  %s1831_s24 = smov 0  }
   0xf   :  { %s1833_s25 = smov 0   ;;  %s1835_s26 = smov 0  }
  0x10   :  { %s1837_s27 = smov 0   ;;  %s1839_s28 = smov 0  }
  0x11 LB: > { %2178 = sst [smem:[#allocation17_spill]] %s1717_s21  ;;  %s1281_s29 = sadd.s32 4294967295, %s1745_s28   ;;  %s1745_s28 = sphi %s1839_s28, %s31_s28   ;;  %s1741_s27 = sphi %s1837_s27, %s2218_s27   ;;  %s1737_s26 = sphi %s1835_s26, %s2213_s26   ;;  %s1733_s25 = sphi %s1833_s25, %s2217_s25   ;;  %s1729_s24 = sphi %s1831_s24, %s2212_s24   ;;  %s1725_s23 = sphi %s1829_s23, %s2216_s23   ;;  %s1721_s22 = sphi %s1827_s22, %s2215_s22   ;;  %s1717_s21 = sphi %s1825_s21, %s2214_s21  }
  0x12   : > { %2179 = sst [smem:[#allocation18_spill]] %s1729_s24  ;;  %s1282_s30 = sadd.s32 4294967294, %s1745_s28  }
  0x13   : > { %2180 = sst [smem:[#allocation19_spill]] %s1737_s26  ;;  %p262_p0 = scmp.ne.s32.totalorder %s1725_s23, %s1721_s22 }
  0x14   : > { %2181 = sst [smem:[#allocation20_spill]] %s1745_s28  ;;  %p263_p1 = scmp.eq.s32.totalorder %s1745_s28, 0 }
  0x15   : > { %p268_p2 = scmp.ne.s32.totalorder %s1721_s22, %s1717_s21  ;;  %p1873_p3 = scmp.eq.s32.totalorder %s1281_s29, 0 }
  0x16   : > { %p322_p4 = scmp.eq.s32.totalorder %s1281_s29, 3  ;;  %p1877_p5 = por %p263_p1, %p262_p0 }
  0x17   : > { %p328_p6 = scmp.eq.s32.totalorder %s1282_s30, 3  ;;  %p1883_p7 = por %p1873_p3, %p268_p2 }
  0x18   : > { %p1887_p8 = por %p322_p4, %p262_p0  ;;  %p1283_p10 = scmp.ge.s32.totalorder %s1745_s28, 1 }
  0x19   : > { %s2184_s16 = scalar_select %p1883_p7, 1, 0 }
  0x1a   : > { %s2185_s17 = scalar_select %p1887_p8, 1, 0 }
  0x1b   : > { %p1891_p9 = por %p328_p6, %p268_p2  ;;  %p365_p11 = scmp.lt.s32.totalorder %s1745_s28, 5 }
  0x1c   : > { %2186 = sst [smem:[#allocation21_spill]] %s2185_s17  ;;  %s1747_s20 = smov [#allocation7]  }
  0x1d   : > { %s2187_s18 = scalar_select %p1891_p9, 1, 0 }
  0x1e   : > { %p1897_p12 = pnand %p1283_p10, %p365_p11  ;;  %s399_s29 = sshll.u32 %s1747_s20, 4  ;;  %s400_s29 = int_to_ptr.vmem [resolvable:$true] %s399_s29 }
  0x1f   : > { %2188 = sst [smem:[#allocation22_spill]] %s2187_s18  ;;  %p1442_p0 = scmp.lt.s32.totalorder %s1745_s28, 4 }
  0x20   : > { %p1421_p13 = pneg %p1897_p12  ;;  %s1546_s18 = scalar_lea.vmem %s400_s29, 512 }
  0x21   : > { %p1912_p2 = pnand %p1442_p0, %p1877_p5  ;;  %p1547_p6 = scmp.ne.s32.totalorder %s400_s29, %s1546_s18 }
  0x22   : > { %p1906_p1 = pnand %p1421_p13, %p1873_p3  ;;  %p1554_p9 = scmp.lt.s32.totalorder %s400_s29, %s400_s29 }
  0x23   : > { %p1555_p13 = scmp.lt.s32.totalorder %s1546_s18, %s1546_s18 }
  0x24   : > { %p1537_p4 = pneg %p1906_p1 }
  0x25   : > { %p1556_p8 = por %p1555_p13, %p1554_p9 }
  0x26   : > { %p1549_p10 = pnand %p1547_p6, %p1537_p4 }
  0x28   : > { %p1550_p11 = pneg %p1549_p10 }
  0x2a   : > { %p1557_p7 = pnand %p1556_p8, %p1550_p11 }
  0x2c   : > { %1560 = shalt.err (!%p1557_p7)
}
  0x2d   : > { %s2167_s15 = smov 128   ;;  %s2168_s20 = smov 8  }
  0x2e   : > { %s2192_s5 = sld [smem:[#allocation25_spill]]  ;;  %s1750_s12 = smov [#allocation4]  }
  0x2f   : > { %s383_s11 = sshll.u32 %s1750_s12, 4  ;;  %s1751_s17 = smov [#allocation9]   ;;  %s384_s11 = int_to_ptr.vmem [resolvable:$true] %s383_s11 }
  0x30   : > { %s415_s18 = sshll.u32 %s1751_s17, 4  ;;  %s1572_s24 = scalar_lea.vmem %s384_s11, 512  ;;  %s416_s18 = int_to_ptr.vmem [resolvable:$true] %s415_s18 }
  0x31   : > { %p1573_p5 = scmp.ne.s32.totalorder %s384_s11, %s1572_s24  ;;  %p1580_p9 = scmp.lt.s32.totalorder %s384_s11, %s384_s11 }
  0x32   : > { %p1581_p0 = scmp.lt.s32.totalorder %s1572_s24, %s1572_s24 }
  0x33   : > { %p1575_p7 = pnand %p1573_p5, %p1537_p4 }
  0x34   : > { %1427 = dma.hbm_to_vmem [thread:$0]  (!%p1906_p1), %s2192_s5, 512, %s400_s29, [#allocation8], %s2167_s15, %s2167_s15, %s2168_s20  }
  0x35   : > { %p1576_p8 = pneg %p1575_p7  ;;  %p1582_p6 = por %p1581_p0, %p1580_p9 }
  0x37   : > { %p1583_p10 = pnand %p1582_p6, %p1576_p8 }
  0x39   : > { %1586 = shalt.err (!%p1583_p10)
}
  0x3a   : > { %s2193_s3 = sld [smem:[#allocation24_spill]]  ;;  %s1598_s28 = scalar_lea.vmem %s416_s18, 512 }
  0x3b   : > { %p1599_p11 = scmp.ne.s32.totalorder %s416_s18, %s1598_s28  ;;  %p1606_p7 = scmp.lt.s32.totalorder %s416_s18, %s416_s18 }
  0x3c   : > { %p1607_p8 = scmp.lt.s32.totalorder %s1598_s28, %s1598_s28 }
  0x3d   : > { %p1601_p13 = pnand %p1599_p11, %p1537_p4 }
  0x3e   : > { %p1608_p9 = por %p1607_p8, %p1606_p7 }
  0x3f   : > { %p1602_p5 = pneg %p1601_p13 }
  0x40   : > { %1424 = dma.hbm_to_vmem [thread:$0]  (!%p1906_p1), %s2193_s3, 512, %s384_s11, [#allocation5], %s2167_s15, %s2167_s15, %s2168_s20  }
  0x41   : > { %p1609_p0 = pnand %p1608_p9, %p1602_p5 }
  0x43   : > { %1612 = shalt.err (!%p1609_p0)
}
  0x44   : > { %s2194_s7 = sld [smem:[#allocation27_spill]]  ;;  %s46_s11 = sadd.s32 1, %s1737_s26 }
  0x45   : > { %p48_p4 = scmp.ge.s32.totalorder %s46_s11, 2  ;;  %s50_s29 = sadd.s32 1, %s1741_s27 }
  0x46   : > { %s440_s12 = sand.u32 1, %s1725_s23   ;;  %s1289_s30 = sshll.u32 %s1741_s27, 3 }
  0x47   : > { %s2220_s11 = smov (%p48_p4, %s46_s11), 0  ;;  %s2222_s29 = smov (!%p48_p4, %s50_s29), %s1741_s27 }
  0x48   : > { %2195 = sst [smem:[#allocation23_spill]] %s2220_s11  ;;  %s251_s21 = ssub.s32 %s1737_s26, %s2220_s11 }
  0x49   : > { %p52_p6 = scmp.ge.s32.totalorder %s2222_s29, 2  ;;  %s1288_s28 = sshll.u32 %s440_s12, 5 }
  0x4a   : > { %1430 = dma.hbm_to_vmem [thread:$0]  (!%p1906_p1), %s2194_s7, 512, %s416_s18, [#allocation8], %s2167_s15, %s2167_s15, %s2168_s20  }
  0x4b   : > { %s450_s24 = sadd.s32 %s1737_s26, %s1289_s30  ;;  %s2224_s29 = smov (%p52_p6, %s2222_s29), 0 }
  0x4c   : > { %s1290_s17 = sshll.u32 %s450_s24, 7  ;;  %s444_s18 = scalar_lea.vmem [#allocation10], %s1288_s28 }
  0x4d   : > { %s453_s15 = sshll.u32 %s444_s18, 4  ;;  %s250_s20 = ssub.s32 %s1741_s27, %s2224_s29  ;;  %s454_s15 = int_to_ptr.vmem [resolvable:$true] %s453_s15 }
  0x4e   : > { %s452_s7 = scalar_lea.hbm %s2153_s9, %s1290_s17  ;;  %s252_s8 = sor.u32 %s251_s21, %s250_s20 }
  0x4f   : > { %p253_p1 = scmp.eq.s32.totalorder %s252_s8, 0  ;;  %s441_s6 = scalar_lea.sflag [#allocation11], %s440_s12 }
  0x50   : > { %p1615_p10 = pneg %p1912_p2  ;;  %s1626_s11 = scalar_lea.vmem %s454_s15, 512 }
  0x51   : > { %p1627_p11 = scmp.ne.s32.totalorder %s454_s15, %s1626_s11  ;;  %s1752_s30 = smov [#allocation10]  }
  0x52   : > { %s1631_s26 = sshll.u32 %s1752_s30, 4  ;;  %s1632_s26 = int_to_ptr.vmem [resolvable:$false] %s1631_s26 }
  0x53   : > { %p1629_p13 = pnand %p1627_p11, %p1615_p10  ;;  %s1633_s28 = scalar_lea.vmem %s1632_s26, 1024 }
  0x54   : > { %p1634_p7 = scmp.lt.s32.totalorder %s454_s15, %s1632_s26  ;;  %p1635_p8 = scmp.lt.s32.totalorder %s1633_s28, %s1626_s11 }
  0x55   : > { %p1630_p5 = pneg %p1629_p13 }
  0x56   : > { %p1636_p9 = por %p1635_p8, %p1634_p7 }
  0x58   : > { %p1637_p0 = pnand %p1636_p9, %p1630_p5 }
  0x5a   : > { %1640 = shalt.err (!%p1637_p0)
}
  0x5b   : > { %s1753_s3 = smov 256   ;;  %s2196_s5 = smov 8  }
  0x5c   : > { %s2197_s20 = smov 128   ;;  %s2198_s12 = sadd.s32 1, %s1725_s23 }
  0x5d   : > { %1434 = dma.hbm_to_vmem [thread:$0]  (!%p1912_p2), %s452_s7, 512, %s454_s15, %s441_s6, %s1753_s3, %s2197_s20, %s2196_s5  }
  0x5e   : > { %s1978_s21 = scalar_select %p253_p1, %s1725_s23, %s2198_s12  }
  0x5f   : > { %465 = sbr.rel (%p1897_p12) target bundleno = 1170 (0x492), region = 60 }
  0x64   : > { %1700 = dma.done.wait (%p1873_p3), [#allocation5], 512  }
  0x65   : > { %1702 = vsyncadd (%p1873_p3), [#allocation5], 4294966784 }
  0x66   : > { %1704 = dma.done.wait (%p1873_p3), [#allocation8], 1024  }
  0x67   : > { %1706 = vsyncadd (%p1873_p3), [#allocation8], 4294966272  ;;  %s1991_s6 = sand.u32 1, %s1721_s22   ;;  %p2199_p12 = scmp.ne.s32.totalorder %s2184_s16, 0 }
  0x68   : > { %s1295_s7 = sshll.u32 %s1991_s6, 5  ;;  %s480_s8 = scalar_lea.sflag [#allocation11], %s1991_s6 }
  0x69   : > { %s1995_s26 = scalar_lea.vmem [#allocation10], %s1295_s7 }
  0x6a   : > { %1708 = dma.done.wait (%p2199_p12), %s480_s8, 512  }
  0x6b   : > { %1710 = vsyncadd (%p2199_p12), %s480_s8, 4294966784  ;;  %p543_p2 = scmp.lt.s32.totalorder %s1733_s25, 1  ;;  %v1754_v0 = vmov 0.0   ;;  %vm1755_vm0 = vmmov 0   ;;  %v576_v1 = vld [vmem:[%s2145_s1 + $0x18] sm:$0xff]  ;;  %v575_v2 = vld [vmem:[%s2145_s1 + $0x10] sm:$0xff] }
  0x6c   : > { %1367 = vmatprep.subr.bf16.mxu1 %v1754_v0  ;;  %1371 = vmatprep.mubr.msk.bf16.mxu1 %vm1755_vm0, %v1754_v0  ;;  %v672_v3 = vld [vmem:[#allocation4 + $0x10] sm:$0xff]  ;;  %vm584_vm1 = vcmask 261120   ;;  %v673_v4 = vld [vmem:[#allocation4 + $0x18] sm:$0xff]  ;;  %v670_v7 = vld [vmem:[#allocation4] sm:$0xff]  ;;  %vm666_vm2 = vcmask 64512   ;;  %s2200_s24 = sld [smem:[#allocation26_spill]] }
  0x6d   : > { %s2006_s13 = scalar_select %p543_p2, %s1733_s25, 1  ;;  %1356 = vmatprep.subr.mxu0 %v576_v1  ;;  %v574_v5 = vld [vmem:[%s2145_s1 + $0x8] sm:$0xff]  ;;  %v675_v6 = vpack.c.bf16 %v673_v4, %v672_v3  ;;  %v671_v8 = vld [vmem:[#allocation4 + $0x8] sm:$0xff]  ;;  %v573_v10 = vld [vmem:[%s2145_s1] sm:$0xff]  ;;  %vm855_vm3 = vcmask 257024   ;;  %vm913_vm4 = vcmask 125952  }
  0x6e   : > { %1357 = vmatpush3.msra.mxu0 %v576_v1  ;;  %v674_v11 = vpack.c.bf16 %v671_v8, %v670_v7  ;;  %v732_v14 = vld [vmem:[#allocation7 + $0x10] sm:$0xff]  ;;  %v733_v15 = vld [vmem:[#allocation7 + $0x18] sm:$0xff]  ;;  %v730_v17 = vld [vmem:[#allocation7] sm:$0xff]  ;;  %s2201_s30 = sld [smem:[#allocation28_spill]]  ;;  %vm914_vm5 = vsmask.f32 3328 }
  0x6f   : > { %s1325_s14 = sshll.u32 %s2006_s13, 4  ;;  %1358 = vmatprep.subr.mxu0 %v575_v2  ;;  %1368 = vmatpush3.bf16.msra.mxu1 %v675_v6  ;;  %v735_v16 = vpack.c.bf16 %v733_v15, %v732_v14  ;;  %v731_v18 = vld [vmem:[#allocation7 + $0x8] sm:$0xff]  ;;  %v1303_v21 = vld [vmem:[%s2146_s2] ss:$0 sm:$0xff]  ;;  %v793_v38 = vld [vmem:[#allocation9 + $0x18] sm:$0xff]  ;;  %s2202_s28 = sld [smem:[#allocation18_spill]] }
  0x70   : > { %s547_s16 = scalar_lea.vmem %s2144_s0, %s1325_s14  ;;  %1359 = vmatpush3.msra.mxu0 %v575_v2  ;;  %1369 = vmatprep.subr.bf16.mxu1 %v1754_v0  ;;  %v734_v19 = vpack.c.bf16 %v731_v18, %v730_v17  ;;  %s553_s7 = scalar_lea.vmem %s2154_s10, %s1325_s14  ;;  %v1306_v23 = vld [vmem:[%s2148_s4] ss:$0 sm:$0xff]  ;;  %v790_v40 = vld [vmem:[#allocation9] sm:$0xff]  ;;  %v791_v41 = vld [vmem:[#allocation9 + $0x8] sm:$0xff]  ;;  %vm995_vm7 = vcmask 130048  }
  0x71   : > { %v571_v9 = vld [vmem:[%s547_s16] sm:$0xff]  ;;  %v572_v12 = vld [vmem:[%s547_s16 + $0x8] sm:$0xff]  ;;  %1360 = vmatprep.subr.mxu0 %v574_v5  ;;  %v794_v42 = vpack.c.bf16 %v791_v41, %v790_v40  ;;  %v920_v4 = vld [vmem:[%s1995_s26 + $0x8] sm:$0xff]  ;;  %s2203_s5 = sld [smem:[#allocation21_spill]]  ;;  %s1321_s12 = sshll.u32 %s1733_s25, 2 }
  0x72   : > { %1364 = vmatprep.mubr.msk.f32.mxu0 %vm584_vm1, %v571_v9  ;;  %1361 = vmatpush3.msra.mxu0 %v574_v5  ;;  %v669_v13 = vpack.c.bf16 %v572_v12, %v571_v9  ;;  %v792_v37 = vld [vmem:[#allocation9 + $0x10] sm:$0xff]  ;;  %v922_v1 = vld [vmem:[%s1995_s26 + $0x18] sm:$0xff]  ;;  %v919_v3 = vld [vmem:[%s1995_s26] sm:$0xff]  ;;  %s2204_s16 = sld [smem:[#allocation29_spill]]  ;;  %s1052_s11 = scalar_lea.sflag [#allocation6], %s1991_s6 }
  0x73   : > { %1362 = vmatprep.subr.mxu0 %v573_v10  ;;  %1370 = vmatpush3.bf16.msra.mxu1 %v674_v11  ;;  %v795_v39 = vpack.c.bf16 %v793_v38, %v792_v37  ;;  %v1308_v53 = vld [vmem:[%s2200_s24] ss:$0 sm:$0xff]  ;;  %v923_v5 = vpack.c.bf16 %v920_v4, %v919_v3  ;;  %vm915_vm6 = vmand %vm913_vm4, %vm914_vm5  ;;  %s1756_s17 = smov [#allocation12]  }
  0x74   : > { %1363 = vmatpush3.msra.mxu0 %v573_v10  ;;  %1383 = vmatprep.subr.bf16.mxu1 %v1754_v0  ;;  %v921_v63 = vld [vmem:[%s1995_s26 + $0x10] sm:$0xff]  ;;  %s1296_s26 = sshll.u32 %s1991_s6, 3  ;;  %s1645_s25 = sshll.u32 %s1756_s17, 4  ;;  %s1646_s25 = int_to_ptr.vmem [resolvable:$false] %s1645_s25 }
  0x75   : > { %1365 = vmatmul.mubr.msk.f32.vlgmr.msra.gmra.mxu0 %vm584_vm1, %v572_v12  ;;  %1375 = vmatprep.subr.bf16.mxu0 %v1754_v0  ;;  %v924_v2 = vpack.c.bf16 %v922_v1, %v921_v63  ;;  %v1310_v12 = vld [vmem:[%s2201_s30] ss:$0 sm:$0xff]  ;;  %s531_s3 = scalar_lea.vmem [#allocation12], %s1296_s26  ;;  %s1647_s18 = scalar_lea.vmem %s1646_s25, 256 }
  0x76   : > { %1379 = vmatprep.mubr.msk.bf16.mxu0 %vm1755_vm0, %v1754_v0  ;;  %1372 = vmatmul.mubr.msk.bf16.vlgmr.msra.gmra.mxu1 %vm584_vm1, %v669_v13  ;;  %s1079_s20 = sshll.u32 %s531_s3, 4  ;;  %s2079_s20 = int_to_ptr.vmem [resolvable:$true] %s1079_s20 }
  0x77   : > { %1387 = vmatprep.mubr.msk.bf16.mxu1 %vm1755_vm0, %v1754_v0  ;;  %1376 = vmatpush3.bf16.msra.mxu0 %v735_v16  ;;  %s1641_s24 = scalar_lea.vmem %s2079_s20, 128  ;;  %p2205_p4 = scmp.ne.s32.totalorder %s2203_s5, 0 }
  0x78   : > { %1377 = vmatprep.subr.bf16.mxu0 %v1754_v0  ;;  %1384 = vmatpush3.bf16.msra.mxu1 %v795_v39  ;;  %p1642_p3 = scmp.ne.s32.totalorder %s2079_s20, %s1641_s24  ;;  %p1648_p10 = scmp.lt.s32.totalorder %s2079_s20, %s1646_s25 }
  0x79   : > { %1385 = vmatprep.subr.bf16.mxu1 %v1754_v0  ;;  %p1649_p11 = scmp.lt.s32.totalorder %s1647_s18, %s1641_s24 }
  0x7a   : > { %p1643_p6 = pnand %p1642_p3, %p2205_p4 }
  0x7b   : > { %1378 = vmatpush3.bf16.msra.mxu0 %v734_v19  ;;  %p1650_p13 = por %p1649_p11, %p1648_p10 }
  0x7c   : > { %1391 = vmatprep.subr.bf16.mxu0 %v1754_v0  ;;  %1386 = vmatpush3.bf16.msra.mxu1 %v794_v42  ;;  %p1644_p1 = pneg %p1643_p6 }
  0x7d   : > { %1399 = vmatprep.subr.bf16.mxu1 %v1754_v0 }
  0x7e   : > { %p1651_p5 = pnand %p1650_p13, %p1644_p1 }
 0x135   : > { %v1366_v20 = vpop.f32.mrf.mxu0 }
 0x136   : > { %v663_v22 = vadd.f32 %v1366_v20, %v1303_v21  ;;  %v720_v24 = vpop.f32.mrf.mxu1 }
 0x137   : > { %v657_v25 = vpop.f32.mrf.mxu0  ;;  %v721_v28 = vadd.f32 %v1306_v23, %v720_v24 }
 0x138   : > { %668 = vst.msk [vmem:[%s553_s7 + $0x8] sm:$0xff] %vm666_vm2, %v663_v22  ;;  %v658_v26 = vadd.f32 %v1303_v21, %v657_v25  ;;  %v1373_v27 = vpop.f32.mrf.mxu1  ;;  %v861_v32 = vsel %vm666_vm2, %v663_v22, -inf  ;;  %v916_v21 = vld [vmem:[#allocation3] sm:$0xf] }
 0x139   : > { %v727_v34 = vmax.f32 %v721_v28, 0.0 }
 0x13a   : > { %667 = vst.msk [vmem:[%s553_s7] sm:$0xff] %vm666_vm2, %v658_v26  ;;  %v858_v29 = vsel %vm666_vm2, %v658_v26, -inf  ;;  %v723_v30 = vpop.f32.mrf.mxu1  ;;  %s1076_s7 = sadd.s32 %s2202_s28, %s1321_s12 }
 0x13b   : > { %859 = vmax.xlane.f32.xlu0 %v858_v29  ;;  %v724_v31 = vadd.f32 %v1306_v23, %v723_v30  ;;  %s1322_s8 = sshll.u32 %s1076_s7, 6 }
 0x13c   : > { %v1374_v33 = vpop.f32.mrf.mxu1  ;;  %s2084_s14 = scalar_lea.hbm %s2204_s16, %s1322_s8 }
 0x13d   : > { %v728_v35 = vmax.f32 %v724_v31, 0.0 }
 0x13f   : > { %862 = vmax.xlane.f32.xlu0 %v861_v32  ;;  %v729_v36 = vpack.c.bf16 %v728_v35, %v727_v34 }
 0x141   : > { %1380 = vmatmul.mubr.msk.bf16.vlgmr.msra.gmra.mxu0 %vm584_vm1, %v729_v36 }
 0x142   : > { %1395 = vmatprep.mubr.msk.bf16.mxu0 %vm1755_vm0, %v1754_v0  ;;  %1392 = vmatpush3.bf16.msra.mxu0 %v924_v2 }
 0x143   : > { %1393 = vmatprep.subr.bf16.mxu0 %v1754_v0 }
 0x146   : > { %1394 = vmatpush3.bf16.msra.mxu0 %v923_v5 }
 0x1c4   : > { %v860_v43 = vpop.xlane.xlu0 %859 }
 0x1c5   : > { %v864_v44 = vsub.f32 %v658_v26, %v860_v43 }
 0x1c7   : > { %v866_v45 = vmul.f32 1.442695, %v864_v44 }
 0x1c8   : > { %v863_v46 = vpop.xlane.xlu0 %862 }
 0x1c9   : > { %1523 = vpow2.f32 %v866_v45  ;;  %v865_v47 = vsub.f32 %v663_v22, %v863_v46 }
 0x1cb   : > { %v868_v48 = vmul.f32 1.442695, %v865_v47 }
 0x1cd   : > { %1525 = vpow2.f32 %v868_v48 }
 0x1d6   : > { %v1524_v49 = vpop.eup %1523 }
 0x1d7   : > { %v870_v50 = vsel %vm666_vm2, %v1524_v49, 0.0 }
 0x1d8   : > { %871 = vadd.xlane.f32.xlu1 %v870_v50 }
 0x1da   : > { %v1526_v51 = vpop.eup %1525 }
 0x1db   : > { %v873_v52 = vsel %vm666_vm2, %v1526_v51, 0.0 }
 0x1dc   : > { %874 = vadd.xlane.f32.xlu1 %v873_v52 }
 0x201   : > { %v780_v54 = vpop.f32.mrf.mxu0 }
 0x202   : > { %v781_v56 = vadd.f32 %v1308_v53, %v780_v54 }
 0x203   : > { %v1381_v55 = vpop.f32.mrf.mxu0 }
 0x204   : > { %v787_v60 = vmax.f32 %v781_v56, 0.0 }
 0x205   : > { %v783_v57 = vpop.f32.mrf.mxu0 }
 0x206   : > { %v784_v58 = vadd.f32 %v1308_v53, %v783_v57 }
 0x207   : > { %v1382_v59 = vpop.f32.mrf.mxu0 }
 0x208   : > { %v788_v61 = vmax.f32 %v784_v58, 0.0 }
 0x20a   : > { %v789_v62 = vpack.c.bf16 %v788_v61, %v787_v60 }
 0x20c   : > { %1388 = vmatmul.mubr.msk.bf16.vlgmr.msra.gmra.mxu1 %vm584_vm1, %v789_v62 }
 0x20d   : > { %1401 = vmatprep.mubr.msk.bf16.mxu1 %vm1755_vm0, %v1754_v0 }
 0x261   : > { %v872_v6 = vpop.xlane.xlu1 %871 }
 0x262   : > { %1527 = vrcp.f32 %v872_v6 }
 0x265   : > { %v875_v7 = vpop.xlane.xlu1 %874 }
 0x266   : > { %1529 = vrcp.f32 %v875_v7 }
 0x26f   : > { %v1528_v8 = vpop.eup %1527 }
 0x270   : > { %v877_v9 = vmul.f32 %v1528_v8, %v1524_v49 }
 0x272   : > { %880 = vxpose.xlu0.b32.start [1/2] (short) (narrow) %v877_v9, 8 }
 0x273   : > { %v1530_v10 = vpop.eup %1529 }
 0x274   : > { %v879_v11 = vmul.f32 %v1530_v10, %v1526_v51 }
 0x276   : > { %881 = vxpose.xlu0.b32.end [2/2] (short) (narrow) %v879_v11, 8 }
 0x2cc   : > { %v840_v13 = vpop.f32.mrf.mxu1 }
 0x2cd   : > { %v841_v14 = vadd.f32 %v1310_v12, %v840_v13 }
 0x2ce   : > { %v1389_v15 = vpop.f32.mrf.mxu1 }
 0x2cf   : > { %v1327_v0 = vpack.c.bf16 %v841_v14, %v841_v14 }
 0x2d0   : > { %v843_v16 = vpop.f32.mrf.mxu1 }
 0x2d1   : > { %856 = vst.msk [vmem:[#allocation2] sm:$0xf] %vm855_vm3, %v1327_v0  ;;  %v844_v17 = vadd.f32 %v1310_v12, %v843_v16 }
 0x2d2   : > { %v1390_v18 = vpop.f32.mrf.mxu1 }
 0x2d3   : > { %v1328_v19 = vpack.c.bf16 %v844_v17, %v844_v17 }
 0x2d5   : > { %857 = vst.msk [vmem:[#allocation2 + $0x4] sm:$0xf] %vm855_vm3, %v1328_v19 }
 0x2dc   : > { %v1522_v20 = vld [vmem:[#allocation2] sm:$0xff]  }
 0x2dd   : > { %1396 = vmatmul.mubr.msk.bf16.vlgmr.msra.gmra.mxu0 %vm584_vm1, %v1522_v20 }
 0x2ee   : > { %v896_v22 = vpop.trf.xlu0 }
 0x2ef   : > { %v912_v23 = vpack.c.bf16 %v896_v22, %v896_v22 }
 0x2f1   : > { %v917_v24 = vsel %vm915_vm6, %v912_v23, %v916_v21 }
 0x2f2   : > { %918 = vst [vmem:[#allocation3] sm:$0xf] %v917_v24 }
 0x2f9   : > { %v994_v35 = vld [vmem:[#allocation3] sm:$0xf] }
 0x39d   : > { %v970_v25 = vpop.f32.mrf.mxu0 }
 0x39f   : > { %v1397_v26 = vpop.f32.mrf.mxu0 }
 0x3a1   : > { %v973_v27 = vpop.f32.mrf.mxu0 }
 0x3a2   : > { %v977_v28 = vpack.c.bf16 %v973_v27, %v970_v25 }
 0x3a3   : > { %v1398_v29 = vpop.f32.mrf.mxu0 }
 0x3a4   : > { %1335 = vst [vmem:[%s531_s3] sm:$0xff] %v977_v28   ;;  %v1318_v30 = vmul.bf16 3216621497, %v977_v28 }
 0x3a6   : > { %1531 = vpow.bf16 %v1318_v30 }
 0x3b4   : > { %v1532_v31 = vpop.eup %1531 }
 0x3b5   : > { %v991_v32 = vadd.bf16 1065369472, %v1532_v31 }
 0x3b7   : > { %1533 = vrcp.bf16 %v991_v32 }
 0x3c5   : > { %v1534_v33 = vpop.eup %1533 }
 0x3c6   : > { %v993_v34 = vmul.bf16 1065369472, %v1534_v33 }
 0x3c8   : > { %1400 = vmatpush3.bf16.msra.mxu1 %v993_v34 }
 0x3cb   : > { %1402 = vmatmul.mubr.msk.bf16.vlgmr.msra.gmra.mxu1 %vm995_vm7, %v994_v35 }
 0x3cc   : > { %1654 = shalt.err (!%p1651_p5)
}
 0x3cd   : > { %s1655_s30 = scalar_lea.hbm %s2084_s14, 128  ;;  %s1659_s12 = scalar_lea.hbm %s2204_s16, 512 }
 0x3ce   : > { %p1656_p7 = scmp.ne.s32.totalorder %s2084_s14, %s1655_s30  ;;  %p1660_p0 = scmp.lt.s32.totalorder %s2084_s14, %s2204_s16 }
 0x3cf   : > { %p1661_p12 = scmp.lt.s32.totalorder %s1659_s12, %s1655_s30 }
 0x3d0   : > { %p1657_p8 = pnand %p1656_p7, %p2205_p4 }
 0x3d1   : > { %p1662_p2 = por %p1661_p12, %p1660_p0 }
 0x3d2   : > { %p1658_p9 = pneg %p1657_p8 }
 0x3d4   : > { %p1663_p3 = pnand %p1662_p2, %p1658_p9 }
 0x3d6   : > { %1666 = shalt.err (!%p1663_p3)
}
 0x3d7   : > { %s1757_s19 = smov 64   ;;  %s1758_s15 = smov 128   ;;  %vm1040_vm8 = vcmask 1043456  }
 0x3d8   : > { %s1759_s24 = smov 4   ;;  %p558_p6 = scmp.lt.s32.totalorder %s2202_s28, 1  ;;  %vm1042_vm9 = vmand %vm1040_vm8, %vm914_vm5 }
 0x3d9   : > { %1419 = dma.vmem_to_hbm [thread:$0]  (%p2205_p4), %s2079_s20, 128, %s2084_s14, %s1052_s11, %s1757_s19, %s1758_s15, %s1759_s24  }
 0x3da   : > { %s2226_s28 = smov (!%p558_p6, %s2202_s28), 1  ;;  %s1301_s17 = sshll.u32 %s2006_s13, 1 }
 0x3db   : > { %s561_s25 = sadd.s32 %s1301_s17, %s2226_s28  ;;  %s2206_s3 = sld [smem:[#allocation30_spill]] }
 0x3dc   : > { %s1302_s18 = sshll.u32 %s561_s25, 2 }
 0x3e1   : > { %s563_s12 = scalar_lea.vmem %s2206_s3, %s1302_s18 }
 0x3e2   : > { %v1043_v37 = vld [vmem:[%s563_s12] sm:$0xf] }
 0x48b   : > { %v1033_v36 = vpop.f32.mrf.mxu1 }
 0x48c   : > { %v1039_v38 = vpack.c.bf16 %v1033_v36, %v1033_v36 }
 0x48d   : > { %v1403_v39 = vpop.f32.mrf.mxu1 }
 0x48e   : > { %v1044_v40 = vsel %vm1042_vm9, %v1039_v38, %v1043_v37 }
 0x48f   : > { %1045 = vst [vmem:[%s563_s12] sm:$0xf] %v1044_v40  ;;  %v1036_v41 = vpop.f32.mrf.mxu1 }
 0x491   : > { %v1404_v42 = vpop.f32.mrf.mxu1 }
 0x492 PF: > { %s2207_s6 = sld [smem:[#allocation20_spill]] }
 0x493   : > { %s2208_s13 = sld [smem:[#allocation17_spill]] }
 0x494   : > { %s2209_s28 = sld [smem:[#allocation22_spill]] }
 0x498   : > { %p1446_p4 = scmp.ge.s32.totalorder %s2207_s6, 2 }
 0x499   : > { %s1106_s5 = sand.u32 1, %s2208_s13  }
 0x49a   : > { %p2210_p1 = scmp.ne.s32.totalorder %s2209_s28, 0  ;;  %s1107_s20 = scalar_lea.sflag [#allocation6], %s1106_s5 }
 0x49c   : > { %p1436_p10 = pnand %p1446_p4, %p2210_p1 }
 0x49e   : > { %p1437_p11 = pneg %p1436_p10 }
 0x4a0   : > { %1712 = dma.done.wait (%p1437_p11), %s1107_s20, 128  }
 0x4a1   : > { %1714 = vsyncadd (%p1437_p11), %s1107_s20, 4294967168  ;;  %s31_s28 = sadd.s32 1, %s2207_s6   ;;  %s2211_s14 = smov %s1978_s21 }
 0x4a2   : > { %p28_p13 = scmp.ge.s32.totalorder %s31_s28, 6   ;;  %s2212_s24 = sld [smem:[#allocation19_spill]] }
 0x4a3   : > { %s2213_s26 = sld [smem:[#allocation23_spill]]  ;;  %s2214_s21 = smov %s1721_s22 }
 0x4a4   : > { %s2215_s22 = smov %s1725_s23  ;;  %s2216_s23 = smov %s2211_s14 }
 0x4a5   : > { %s2217_s25 = smov %s1741_s27  ;;  %s2218_s27 = smov %s2224_s29 }
 0x4a6   :  { %30 = sbr.rel (!%p28_p13) target bundleno = 17 (0x11), region = 149 }
 0x4ab   :  { %1124 = vsyncpa [#allocation5], 1 }
 0x4ac   :  { %1126 = vsyncpa [#allocation5 + $0x1], 1 }
 0x4ad   :  { %1127 = vsyncpa [#allocation8], 1 }
 0x4ae   :  { %1128 = vsyncpa [#allocation11], 1 }
 0x4af   :  { %1130 = vsyncpa [#allocation11 + $0x1], 1 }
 0x4b0   :  { %1131 = vsyncpa [#allocation6], 1 }
 0x4b1   :  { %1133 = vsyncpa [#allocation6 + $0x1], 1 }

</bundles_post_ra>
